<compile_context>
chip_gen: v6e
topology: v6e:2x2x1
jax: 0.10.0
libtpu: 0.0.40
codegen_flags: <defaults>
</compile_context>

<pallas_src>
import functools

import jax
import jax.numpy as jnp
from jax import lax
from jax.experimental import pallas as pl
from jax.experimental.pallas import tpu as pltpu

_EPS_COS = 1e-8   # F.cosine_similarity default eps (per-norm clamp)


def ge2e_kernel(emb_ref, w_ref, b_ref, loss_ref, *, N, M, NM_pad):
    """emb_ref: (NM_pad, D_pad) zero-padded flat embeddings (native dtype).

    w_ref / b_ref: (1,) SMEM scalars.  loss_ref: (1, 1) VMEM f32 output.
    """
    emb = emb_ref[...]                                  # native dtype, (NM_pad, Dp)
    w = w_ref[0]
    b = b_ref[0]
    f32 = jnp.float32

    # ---- static speaker masks from iota (rows j = n*M + m; padded rows -> 0) ----
    # same_b[j, k] = True iff row j belongs to speaker k.  Padded rows (j >= N*M)
    # are all-False, so they drop out of every masked sum below.
    jj = lax.broadcasted_iota(jnp.int32, (NM_pad, N), 0)
    kk = lax.broadcasted_iota(jnp.int32, (NM_pad, N), 1)
    same_b = (jj >= kk * M) & (jj < (kk + 1) * M)                        # (NM_pad, N)

    # Exact 0/1 mask in matmul (A @ B) orientation for the centroid reduction;
    # the 1/M scale is applied to the tiny (N, Dp) output, not a big operand.
    nn = lax.broadcasted_iota(jnp.int32, (N, NM_pad), 0)
    rr = lax.broadcasted_iota(jnp.int32, (N, NM_pad), 1)
    spk_rows = ((rr >= nn * M) & (rr < (nn + 1) * M)).astype(emb.dtype)  # (N, NM_pad)

    # row_valid[j] = 1 for real rows, 0 for padding (single iota compare).
    row_valid = (lax.broadcasted_iota(jnp.int32, (NM_pad, 1), 0)
                 < N * M).astype(f32)                                    # (NM_pad, 1)

    # ---- speaker centroids (mean over utterances): one small MXU matmul ----
    cent = lax.dot_general(spk_rows, emb, (((1,), (0,)), ((), ())),
                           preferred_element_type=f32) * f32(1.0 / M)    # (N, Dp) f32

    # ---- raw dots e_j . cent_k : the ONLY big MXU pass over the slab ----
    cent_e = cent.astype(emb.dtype)
    dots = lax.dot_general(emb, cent_e, (((1,), (1,)), ((), ())),
                           preferred_element_type=f32)                   # (NM_pad, N)

    # ---- squared norms (one f32 element-wise pass over the slab) ----
    emb_f = emb.astype(f32)
    e2 = jnp.sum(emb_f * emb_f, axis=-1, keepdims=True)                  # (NM_pad, 1)
    eps2 = f32(_EPS_COS * _EPS_COS)
    inv_e = lax.rsqrt(jnp.maximum(e2, eps2))          # == 1 / max(||e||, eps)

    # Own-speaker pieces, all derived from the tiny (NM_pad, N) dots tensor:
    #   d_own[j]  = e_j . cent_{spk(j)}
    #   c2_row[k] = ||cent_k||^2        (since M*cent_k = sum_{j in k} e_j)
    #   c2_own[j] = ||cent_{spk(j)}||^2
    dsame = jnp.where(same_b, dots, f32(0.0))                            # (NM_pad, N)
    d_own = jnp.sum(dsame, axis=-1, keepdims=True)                       # (NM_pad, 1)
    c2_row = jnp.sum(dsame, axis=0, keepdims=True) * f32(1.0 / M)        # (1, N)
    c2_own = jnp.sum(jnp.where(same_b, c2_row, f32(0.0)),
                     axis=-1, keepdims=True)                             # (NM_pad, 1)
    inv_c_row = lax.rsqrt(jnp.maximum(c2_row, eps2))                     # (1, N)

    # ---- cos(e_j, centroid_k) for ALL k: scale raw dots by row/col inv-norms ----
    cos_all = dots * inv_e * inv_c_row                                   # (NM_pad, N)

    # ---- same-speaker (utterance-exclusive centroid) cosine via algebra ----
    #   e . utt_cent    = (M * e.cent_own - ||e||^2) / (M-1)
    #   ||utt_cent||^2  = (M^2 ||cent_own||^2 - 2M e.cent_own + ||e||^2) / (M-1)^2
    inv_m1 = f32(1.0 / (M - 1))
    dot_excl = (M * d_own - e2) * inv_m1
    u2 = (M * M * c2_own - 2.0 * M * d_own + e2) * (inv_m1 * inv_m1)
    inv_u = lax.rsqrt(jnp.maximum(u2, eps2))
    cos_same = dot_excl * inv_e * inv_u                                  # (NM_pad, 1)

    # ---- splice diagonal, sim matrix, GE2E softmax loss ----
    cossim = jnp.where(same_b, cos_same, cos_all) + 1e-6                 # (NM_pad, N)
    sim = w * cossim + b
    pos = w * (cos_same + 1e-6) + b                                      # diag, direct
    neg = jnp.log(jnp.sum(jnp.exp(sim), axis=-1, keepdims=True) + 1e-6)  # (NM_pad, 1)
    per_loss = (neg - pos) * row_valid
    loss_ref[...] = jnp.sum(per_loss).reshape(1, 1)


def ge2e_loss(embeddings, w, b):
    """embeddings: (N, M, D) array (any float dtype); w, b: scalars."""
    N, M, D = embeddings.shape
    assert M >= 2, "GE2E exclusive centroid needs at least 2 utterances/speaker."
    NM = N * M

    # Sublane packing depends on element width: f32 -> 8 rows/vreg, bf16 -> 16.
    itemsize = jnp.dtype(embeddings.dtype).itemsize
    sub = {4: 8, 2: 16, 1: 32}.get(itemsize, 8)
    NM_pad = ((NM + sub - 1) // sub) * sub
    D_pad = ((D + 127) // 128) * 128

    # Lane-dense 2-D slab; only pad when the shape is not already vreg-aligned
    # (zero padding does not change any dot or norm; padded rows are masked).
    emb_flat = embeddings.reshape(NM, D)
    if NM_pad != NM or D_pad != D:
        emb_flat = jnp.pad(emb_flat, ((0, NM_pad - NM), (0, D_pad - D)))

    w_arr = jnp.asarray([w], dtype=jnp.float32)
    b_arr = jnp.asarray([b], dtype=jnp.float32)

    kernel = functools.partial(ge2e_kernel, N=N, M=M, NM_pad=NM_pad)
    # TODO(synk): for very large N*M*D (esp. v7x with 64 MiB VMEM) switch to a
    # centroid pass + row-tiled parallel loss pass; grid-less is right here.
    out = pl.pallas_call(
        kernel,
        out_shape=jax.ShapeDtypeStruct((1, 1), jnp.float32),
        in_specs=[
            pl.BlockSpec(memory_space=pltpu.MemorySpace.VMEM),   # embeddings (native)
            pl.BlockSpec(memory_space=pltpu.MemorySpace.SMEM),   # w
            pl.BlockSpec(memory_space=pltpu.MemorySpace.SMEM),   # b
        ],
        out_specs=pl.BlockSpec(memory_space=pltpu.MemorySpace.VMEM),
    )(emb_flat, w_arr, b_arr)
    return out[0, 0]


def ge2e_loss_ref(embeddings, w, b):
    """Pure-JAX reference (mirrors the PyTorch code) for validation."""
    emb = embeddings.astype(jnp.float32)
    N, M, D = emb.shape
    cent = emb.mean(axis=1)
    utt_cent = (emb.sum(axis=1, keepdims=True) - emb) / (M - 1)

    def cos(a, b_):
        na = jnp.maximum(jnp.linalg.norm(a, axis=-1), _EPS_COS)
        nb = jnp.maximum(jnp.linalg.norm(b_, axis=-1), _EPS_COS)
        return jnp.sum(a * b_, axis=-1) / (na * nb)

    cos_same = cos(emb, utt_cent)                                  # (N, M)
    cos_diff = cos(emb[:, :, None, :], cent[None, None, :, :])     # (N, M, N)
    same = jnp.eye(N, dtype=bool)[:, None, :]
    cossim = jnp.where(same, cos_same[:, :, None], cos_diff) + 1e-6
    sim = w * cossim + b
    pos = jnp.sum(jnp.where(same, sim, 0.0), axis=-1)
    neg = jnp.log(jnp.exp(sim).sum(axis=-1) + 1e-6)
    return jnp.sum(neg - pos)


if __name__ == "__main__":
    # Module parameters (deterministic, from __init__): w = 10.0, b = -5.0
    W_INIT, B_INIT = 10.0, -5.0

    # Small synthetic batch: 4 speakers x 5 utterances x 64-d embeddings.
    key = jax.random.PRNGKey(0)
    embeddings = jax.random.normal(key, (4, 5, 64), dtype=jnp.float32)

    loss = ge2e_loss(embeddings, W_INIT, B_INIT)
    loss = jax.block_until_ready(loss)

    ref = ge2e_loss_ref(embeddings, W_INIT, B_INIT)
    # Exclusive-centroid algebra + MXU contraction change FP association vs the
    # explicit reference path, hence the slightly relaxed tolerance.
    assert jnp.allclose(loss, ref, rtol=1e-4, atol=1e-4), (loss, ref)

    print("KERNEL_OK")
</pallas_src>

<mosaic_0001>
module attributes {stable_mosaic.version = 11 : i64} {
  func.func @ge2e_kernel(%arg0: memref<24x128xf32, #tpu.memory_space<vmem>>, %arg1: memref<1xf32, #tpu.memory_space<smem>>, %arg2: memref<1xf32, #tpu.memory_space<smem>>, %arg3: memref<1x1xf32, #tpu.memory_space<vmem>>) attributes {dimension_semantics = [], scalar_prefetch = 0 : i64, scratch_operands = 0 : i64, tpu.core_type = #tpu.core_type<tc>} {
    %c0 = arith.constant 0 : index
    %c0_0 = arith.constant 0 : index
    %0 = vector.load %arg0[%c0, %c0_0] : memref<24x128xf32, #tpu.memory_space<vmem>>, vector<24x128xf32>
    %c0_1 = arith.constant 0 : index
    %1 = memref.load %arg1[%c0_1] : memref<1xf32, #tpu.memory_space<smem>>
    %c0_2 = arith.constant 0 : index
    %2 = memref.load %arg2[%c0_2] : memref<1xf32, #tpu.memory_space<smem>>
    %3 = tpu.iota {dimensions = array<i32: 0>} : vector<24x4xi32>
    %4 = tpu.iota {dimensions = array<i32: 1>} : vector<24x4xi32>
    %c5_i32 = arith.constant 5 : i32
    %5 = vector.broadcast %c5_i32 : i32 to vector<24x4xi32>
    %6 = arith.muli %4, %5 : vector<24x4xi32>
    %7 = arith.cmpi sge, %3, %6 : vector<24x4xi32>
    %c1_i32 = arith.constant 1 : i32
    %8 = vector.broadcast %c1_i32 : i32 to vector<24x4xi32>
    %9 = arith.addi %4, %8 : vector<24x4xi32>
    %c5_i32_3 = arith.constant 5 : i32
    %10 = vector.broadcast %c5_i32_3 : i32 to vector<24x4xi32>
    %11 = arith.muli %9, %10 : vector<24x4xi32>
    %12 = arith.cmpi slt, %3, %11 : vector<24x4xi32>
    %13 = arith.andi %7, %12 : vector<24x4xi1>
    %14 = tpu.iota {dimensions = array<i32: 0>} : vector<4x24xi32>
    %15 = tpu.iota {dimensions = array<i32: 1>} : vector<4x24xi32>
    %c5_i32_4 = arith.constant 5 : i32
    %16 = vector.broadcast %c5_i32_4 : i32 to vector<4x24xi32>
    %17 = arith.muli %14, %16 : vector<4x24xi32>
    %18 = arith.cmpi sge, %15, %17 : vector<4x24xi32>
    %c1_i32_5 = arith.constant 1 : i32
    %19 = vector.broadcast %c1_i32_5 : i32 to vector<4x24xi32>
    %20 = arith.addi %14, %19 : vector<4x24xi32>
    %c5_i32_6 = arith.constant 5 : i32
    %21 = vector.broadcast %c5_i32_6 : i32 to vector<4x24xi32>
    %22 = arith.muli %20, %21 : vector<4x24xi32>
    %23 = arith.cmpi slt, %15, %22 : vector<4x24xi32>
    %24 = arith.andi %18, %23 : vector<4x24xi1>
    %25 = arith.extui %24 : vector<4x24xi1> to vector<4x24xi32>
    %26 = arith.sitofp %25 : vector<4x24xi32> to vector<4x24xf32>
    %27 = tpu.iota {dimensions = array<i32: 0>} : vector<24x1xi32>
    %c20_i32 = arith.constant 20 : i32
    %28 = vector.broadcast %c20_i32 : i32 to vector<24x1xi32>
    %29 = arith.cmpi slt, %27, %28 : vector<24x1xi32>
    %30 = arith.extui %29 : vector<24x1xi1> to vector<24x1xi32>
    %31 = arith.sitofp %30 : vector<24x1xi32> to vector<24x1xf32>
    %cst = arith.constant dense<0.000000e+00> : vector<4x128xf32>
    %32 = tpu.matmul %26, %0, %cst {dimension_numbers = #tpu.dot_dimension_numbers<[1], [0], [0], [1], [0, 0, 1, 1], [], []>} : vector<4x24xf32>, vector<24x128xf32>, vector<4x128xf32> -> vector<4x128xf32>
    %cst_7 = arith.constant 2.000000e-01 : f32
    %33 = vector.broadcast %cst_7 : f32 to vector<4x128xf32>
    %34 = arith.mulf %32, %33 : vector<4x128xf32>
    %cst_8 = arith.constant dense<0.000000e+00> : vector<24x4xf32>
    %35 = tpu.matmul %0, %34, %cst_8 {dimension_numbers = #tpu.dot_dimension_numbers<[1], [1], [0], [0], [0, 0, 1, 0], [], []>} : vector<24x128xf32>, vector<4x128xf32>, vector<24x4xf32> -> vector<24x4xf32>
    %36 = arith.mulf %0, %0 : vector<24x128xf32>
    %cst_9 = arith.constant dense<0.000000e+00> : vector<24xf32>
    %37 = vector.multi_reduction <add>, %36, %cst_9 [1] : vector<24x128xf32> to vector<24xf32>
    %38 = vector.shape_cast %37 : vector<24xf32> to vector<24x1xf32>
    %cst_10 = arith.constant 1.000000e-16 : f32
    %39 = vector.broadcast %cst_10 : f32 to vector<24x1xf32>
    %40 = arith.maximumf %38, %39 : vector<24x1xf32>
    %41 = math.rsqrt %40 : vector<24x1xf32>
    %cst_11 = arith.constant 0.000000e+00 : f32
    %42 = vector.broadcast %cst_11 : f32 to vector<24x4xf32>
    %43 = arith.select %13, %35, %42 : vector<24x4xi1>, vector<24x4xf32>
    %cst_12 = arith.constant dense<0.000000e+00> : vector<24xf32>
    %44 = vector.multi_reduction <add>, %43, %cst_12 [1] : vector<24x4xf32> to vector<24xf32>
    %45 = vector.shape_cast %44 : vector<24xf32> to vector<24x1xf32>
    %cst_13 = arith.constant dense<0.000000e+00> : vector<4xf32>
    %46 = vector.multi_reduction <add>, %43, %cst_13 [0] : vector<24x4xf32> to vector<4xf32>
    %47 = vector.shape_cast %46 : vector<4xf32> to vector<1x4xf32>
    %cst_14 = arith.constant 2.000000e-01 : f32
    %48 = vector.broadcast %cst_14 : f32 to vector<1x4xf32>
    %49 = arith.mulf %47, %48 : vector<1x4xf32>
    %cst_15 = arith.constant 0.000000e+00 : f32
    %50 = vector.shape_cast %49 : vector<1x4xf32> to vector<1x4xf32>
    %51 = vector.broadcast %50 : vector<1x4xf32> to vector<24x4xf32>
    %52 = vector.broadcast %cst_15 : f32 to vector<24x4xf32>
    %53 = arith.select %13, %51, %52 : vector<24x4xi1>, vector<24x4xf32>
    %cst_16 = arith.constant dense<0.000000e+00> : vector<24xf32>
    %54 = vector.multi_reduction <add>, %53, %cst_16 [1] : vector<24x4xf32> to vector<24xf32>
    %55 = vector.shape_cast %54 : vector<24xf32> to vector<24x1xf32>
    %cst_17 = arith.constant 1.000000e-16 : f32
    %56 = vector.broadcast %cst_17 : f32 to vector<1x4xf32>
    %57 = arith.maximumf %49, %56 : vector<1x4xf32>
    %58 = math.rsqrt %57 : vector<1x4xf32>
    %59 = vector.broadcast %41 : vector<24x1xf32> to vector<24x4xf32>
    %60 = arith.mulf %35, %59 : vector<24x4xf32>
    %61 = vector.broadcast %58 : vector<1x4xf32> to vector<24x4xf32>
    %62 = arith.mulf %60, %61 : vector<24x4xf32>
    %cst_18 = arith.constant 5.000000e+00 : f32
    %63 = vector.broadcast %cst_18 : f32 to vector<24x1xf32>
    %64 = arith.mulf %63, %45 : vector<24x1xf32>
    %65 = arith.subf %64, %38 : vector<24x1xf32>
    %cst_19 = arith.constant 2.500000e-01 : f32
    %66 = vector.broadcast %cst_19 : f32 to vector<24x1xf32>
    %67 = arith.mulf %65, %66 : vector<24x1xf32>
    %cst_20 = arith.constant 2.500000e+01 : f32
    %68 = vector.broadcast %cst_20 : f32 to vector<24x1xf32>
    %69 = arith.mulf %68, %55 : vector<24x1xf32>
    %cst_21 = arith.constant 1.000000e+01 : f32
    %70 = vector.broadcast %cst_21 : f32 to vector<24x1xf32>
    %71 = arith.mulf %70, %45 : vector<24x1xf32>
    %72 = arith.subf %69, %71 : vector<24x1xf32>
    %73 = arith.addf %72, %38 : vector<24x1xf32>
    %cst_22 = arith.constant 2.500000e-01 : f32
    %cst_23 = arith.constant 2.500000e-01 : f32
    %74 = arith.mulf %cst_22, %cst_23 : f32
    %75 = vector.broadcast %74 : f32 to vector<24x1xf32>
    %76 = arith.mulf %73, %75 : vector<24x1xf32>
    %cst_24 = arith.constant 1.000000e-16 : f32
    %77 = vector.broadcast %cst_24 : f32 to vector<24x1xf32>
    %78 = arith.maximumf %76, %77 : vector<24x1xf32>
    %79 = math.rsqrt %78 : vector<24x1xf32>
    %80 = arith.mulf %67, %41 : vector<24x1xf32>
    %81 = arith.mulf %80, %79 : vector<24x1xf32>
    %82 = vector.shape_cast %81 : vector<24x1xf32> to vector<24x1xf32>
    %83 = vector.broadcast %82 : vector<24x1xf32> to vector<24x4xf32>
    %84 = arith.select %13, %83, %62 : vector<24x4xi1>, vector<24x4xf32>
    %cst_25 = arith.constant 9.99999997E-7 : f32
    %85 = vector.broadcast %cst_25 : f32 to vector<24x4xf32>
    %86 = arith.addf %84, %85 : vector<24x4xf32>
    %87 = vector.broadcast %1 : f32 to vector<24x4xf32>
    %88 = arith.mulf %87, %86 : vector<24x4xf32>
    %89 = vector.broadcast %2 : f32 to vector<24x4xf32>
    %90 = arith.addf %88, %89 : vector<24x4xf32>
    %cst_26 = arith.constant 9.99999997E-7 : f32
    %91 = vector.broadcast %cst_26 : f32 to vector<24x1xf32>
    %92 = arith.addf %81, %91 : vector<24x1xf32>
    %93 = vector.broadcast %1 : f32 to vector<24x1xf32>
    %94 = arith.mulf %93, %92 : vector<24x1xf32>
    %95 = vector.broadcast %2 : f32 to vector<24x1xf32>
    %96 = arith.addf %94, %95 : vector<24x1xf32>
    %97 = math.exp %90 : vector<24x4xf32>
    %cst_27 = arith.constant dense<0.000000e+00> : vector<24xf32>
    %98 = vector.multi_reduction <add>, %97, %cst_27 [1] : vector<24x4xf32> to vector<24xf32>
    %99 = vector.shape_cast %98 : vector<24xf32> to vector<24x1xf32>
    %cst_28 = arith.constant 9.99999997E-7 : f32
    %100 = vector.broadcast %cst_28 : f32 to vector<24x1xf32>
    %101 = arith.addf %99, %100 : vector<24x1xf32>
    %102 = math.log %101 : vector<24x1xf32>
    %103 = arith.subf %102, %96 : vector<24x1xf32>
    %104 = arith.mulf %103, %31 : vector<24x1xf32>
    %105 = vector.shape_cast %104 : vector<24x1xf32> to vector<1x24x1xf32>
    %cst_29 = arith.constant dense<0.000000e+00> : vector<1xf32>
    %106 = vector.multi_reduction <add>, %105, %cst_29 [1, 2] : vector<1x24x1xf32> to vector<1xf32>
    %107 = vector.shape_cast %106 : vector<1xf32> to vector<1x1x1xf32>
    %108 = vector.extract %107[0, 0, 0] : f32 from vector<1x1x1xf32>
    %109 = vector.broadcast %108 : f32 to vector<1x1xf32>
    %c0_30 = arith.constant 0 : index
    %c0_31 = arith.constant 0 : index
    %110 = vector.load %arg3[%c0_30, %c0_31] : memref<1x1xf32, #tpu.memory_space<vmem>>, vector<1x1xf32>
    tpu.vector_store %arg3[%c0_30, %c0_31], %109 {strides = array<i32>} : memref<1x1xf32, #tpu.memory_space<vmem>>, vector<1x1xf32>,
    return
  }
}

</mosaic_0001>

<bundles_post_ra>
// kernel: tpu_custom_call.1
= control target key start
LH: loop header
LB: loop body
LE: loop exit
PB: predicated region body
PF: predicated region fallthrough
CT: control target
= control target key end

     0   :  { %10 = vsyncpa [#allocation5], 0  ;;  %s635_s0 = inlined_call_operand.hbm [shape: f32[24,128], index: 0, kind: input, shape index: {}]   ;;  %s636_s1 = inlined_call_operand.<no memory space> [shape: f32[1], index: 1, kind: input, shape index: {}]   ;;  %s637_s2 = inlined_call_operand.<no memory space> [shape: f32[1], index: 2, kind: input, shape index: {}]   ;;  %s638_s3 = inlined_call_operand.hbm [shape: f32[1,1], index: 3, kind: output, shape index: {}]  }
   0x1   :  { %11 = vsyncpa [#allocation6], 0  ;;  %s514_s12 = smov [#allocation4]  }
   0x2   :  { %s17_s13 = sshll.u32 %s514_s12, 4  ;;  %s18_s13 = int_to_ptr.vmem [resolvable:$true] %s17_s13 }
   0x3   :  { %s478_s14 = scalar_lea.vmem %s18_s13, 384  ;;  %p483_p1 = scmp.lt.s32.totalorder %s18_s13, %s18_s13 }
   0x4   :  { %p479_p0 = scmp.ne.s32.totalorder %s18_s13, %s478_s14  ;;  %p484_p2 = scmp.lt.s32.totalorder %s478_s14, %s478_s14 }
   0x6   :  { %p485_p3 = por %p484_p2, %p483_p1 }
   0x8   :  { %p486_p4 = pnand %p485_p3, %p479_p0 }
   0xa   :  { %489 = shalt.err (!%p486_p4)
}
   0xb   :  { %s515_s15 = smov 128   ;;  %s516_s16 = smov 8  }
   0xc   :  { %23 = dma.hbm_to_vmem [thread:$0]  %s635_s0, 384, %s18_s13, [#allocation5], %s515_s15, %s515_s15, %s516_s16  }
   0xd   :  { %510 = dma.done.wait [#allocation5], 384  }
   0xe   :  { %511 = vsyncadd [#allocation5], 4294966912  ;;  %v36_v0 = vlaneseq  ;;  %v517_v1 = vmov 0.0   ;;  %vm518_vm0 = vmmov 0   ;;  %v549_v7 = vld [vmem:[#allocation4 + $0x10] sm:$0xff]  ;;  %v551_v8 = vld [vmem:[#allocation4 + $0x8] sm:$0xff] }
   0xf   :  { %416 = vmatprep.subr.mxu0 %v517_v1  ;;  %422 = vmatprep.mubr.msk.f32.mxu0 %vm518_vm0, %v517_v1  ;;  %v31_v9 = vld [vmem:[#allocation4] sm:$0xff]  ;;  %vm71_vm4 = vcmask 195584   ;;  %vm244_vm8 = vcmask 31744   ;;  %v228_v51 = vmul.f32 %v549_v7, %v549_v7  ;;  %v227_v54 = vmul.f32 %v551_v8, %v551_v8 }
  0x10   :  { %v37_v2 = vshrl.u32 %v36_v0, 7  ;;  %v41_v3 = vand.u32 127, %v36_v0  ;;  %425 = vmatprep.subr.mxu1 %v517_v1  ;;  %427 = vmatprep.mubr.msk.f32.mxu1 %vm518_vm0, %v517_v1  ;;  %v226_v11 = vmul.f32 %v31_v9, %v31_v9 }
  0x11   :  { %417 = vmatpush3.msra.mxu0 %v549_v7 }
  0x12   :  { %v54_v4 = vmul.u32 5, %v37_v2  ;;  %v56_v5 = vadd.s32 1, %v37_v2  ;;  %418 = vmatprep.subr.mxu0 %v517_v1  ;;  %229 = vadd.xlane.f32.xlu0 %v226_v11  ;;  %v46_v15 = vadd.s32 1, %v41_v3  ;;  %v42_v16 = vmul.u32 5, %v41_v3 }
  0x13   :  { %419 = vmatpush3.msra.mxu0 %v551_v8  ;;  %v38_v18 = vadd.s32 8, %v37_v2  ;;  %v568_v20 = vadd.s32 16, %v37_v2 }
  0x14   :  { %vm55_vm1 = vcmp.ge.s32.totalorder %v41_v3, %v54_v4  ;;  %v57_v6 = vmul.u32 5, %v56_v5  ;;  %420 = vmatprep.subr.mxu0 %v517_v1  ;;  %v47_v17 = vmul.u32 5, %v46_v15  ;;  %vm43_vm5 = vcmp.ge.s32.totalorder %v37_v2, %v42_v16 }
  0x15   :  { %421 = vmatpush3.msra.mxu0 %v31_v9  ;;  %vm44_vm9 = vcmp.ge.s32.totalorder %v38_v18, %v42_v16  ;;  %vm45_vm12 = vcmp.ge.s32.totalorder %v568_v20, %v42_v16  ;;  %vm64_vm15 = vcmp.lt.s32.totalorder %v568_v20, 20 }
  0x16   :  { %vm58_vm2 = vcmp.lt.s32.totalorder %v41_v3, %v57_v6  ;;  %vm48_vm6 = vcmp.lt.s32.totalorder %v37_v2, %v47_v17  ;;  %vm49_vm10 = vcmp.lt.s32.totalorder %v38_v18, %v47_v17  ;;  %vm50_vm13 = vcmp.lt.s32.totalorder %v568_v20, %v47_v17 }
  0x17   :  { %vm59_vm3 = vmand %vm55_vm1, %vm58_vm2  ;;  %vm388_vm1 = vcmask 0  }
  0x18   :  { %v405_v10 = vsel %vm59_vm3, 1.0, %v517_v1  ;;  %vm564_vm7 = vmand %vm43_vm5, %vm48_vm6 }
  0x19   :  { %423 = vmatmul.mubr.msk.f32.vlgmr.msra.gmra.mxu0 %vm71_vm4, %v405_v10  ;;  %vm573_vm11 = vmand %vm44_vm9, %vm49_vm10 }
  0x1a   :  { %vm585_vm14 = vmand %vm45_vm12, %vm50_vm13 }
  0x9b   :  { %v230_v40 = vpop.xlane.xlu0 %229 }
  0x9c   :  { %v235_v42 = vmax.f32 %v230_v40, 1e-16 }
  0x9e   :  { %444 = vrsqrt.f32 %v235_v42 }
  0xab   :  { %v445_v55 = vpop.eup %444 }
  0xd9   :  { %v141_v12 = vpop.f32.mrf.mxu0 }
  0xda   :  { %v145_v13 = vmul.f32 0.2, %v141_v12 }
  0xdb   :  { %v424_v14 = vpop.f32.mrf.mxu0 }
  0xdc   :  { %426 = vmatpush3.xpose.msra.mxu1 %v145_v13 }
  0xdf   :  { %428 = vmatmul.mubr.f32.vlgmr.msra.gmra.mxu1 %v31_v9 }
  0xe0   :  { %430 = vmatprep.mubr.msk.f32.mxu1 %vm518_vm0, %v517_v1 }
  0xe3   :  { %431 = vmatmul.mubr.f32.gmra.mxu1 %v551_v8 }
  0xe4   :  { %433 = vmatprep.mubr.msk.f32.mxu1 %vm518_vm0, %v517_v1  ;;  %vm372_vm0 = vcmask 7168  }
  0xe7   :  { %434 = vmatmul.mubr.f32.gmra.mxu1 %v549_v7 }
 0x19f   :  { %v212_v21 = vpop.f32.mrf.mxu1 }
 0x1a0   :  { %v241_v22 = vsel %vm564_vm7, %v212_v21, 0.0  ;;  %v277_v56 = vmul.f32 %v445_v55, %v212_v21 }
 0x1a1   :  { %v429_v23 = vpop.f32.mrf.mxu1  ;;  %v245_v24 = vsel %vm244_vm8, %v241_v22, 0.0 }
 0x1a2   :  { %246 = vadd.xlane.f32.xlu0 %v245_v24 }
 0x1a3   :  { %v579_v26 = vpop.f32.mrf.mxu1 }
 0x1a4   :  { %v242_v27 = vsel %vm573_vm11, %v579_v26, 0.0 }
 0x1a5   :  { %v432_v28 = vpop.f32.mrf.mxu1  ;;  %v248_v29 = vsel %vm244_vm8, %v242_v27, 0.0 }
 0x1a6   :  { %249 = vadd.xlane.f32.xlu0 %v248_v29  ;;  %v254_v32 = vadd.f32 %v248_v29, %v245_v24 }
 0x1a7   :  { %v589_v31 = vpop.f32.mrf.mxu1 }
 0x1a8   :  { %v243_v33 = vsel %vm585_vm14, %v589_v31, 0.0 }
 0x1a9   :  { %v435_v34 = vpop.f32.mrf.mxu1  ;;  %v251_v35 = vsel %vm244_vm8, %v243_v33, 0.0 }
 0x1aa   :  { %252 = vadd.xlane.f32.xlu1 %v251_v35  ;;  %v255_v36 = vadd.f32 %v254_v32, %v251_v35 }
 0x1ac   :  { %v256_v37 = vrot.slane %v255_v36, 4 }
 0x1ae   :  { %v257_v38 = vadd.f32 %v256_v37, %v255_v36 }
 0x1b0   :  { %v258_v39 = vrot.slane %v257_v38, 2 }
 0x1b2   :  { %v259_v41 = vadd.f32 %v258_v39, %v257_v38 }
 0x1b4   :  { %v260_v43 = vrot.slane %v259_v41, 1 }
 0x1b6   :  { %v261_v44 = vadd.f32 %v260_v43, %v259_v41 }
 0x1b8   :  { %v262_v45 = vmul.f32 0.2, %v261_v44 }
 0x1ba   :  { %v275_v46 = vmax.f32 %v262_v45, 1e-16  ;;  %v264_v47 = vsel %vm573_vm11, %v262_v45, 0.0  ;;  %v263_v48 = vsel %vm564_vm7, %v262_v45, 0.0  ;;  %v265_v52 = vsel %vm585_vm14, %v262_v45, 0.0 }
 0x1bb   :  { %v269_v49 = vsel %vm244_vm8, %v264_v47, 0.0  ;;  %v266_v50 = vsel %vm244_vm8, %v263_v48, 0.0  ;;  %v272_v53 = vsel %vm244_vm8, %v265_v52, 0.0  ;;  %v325_v45 = vstv %s636_s1  ;;  %s519_s1 = smov [#allocation7]  }
 0x1bc   :  { %446 = vrsqrt.f32 %v275_v46  ;;  %270 = vadd.xlane.f32.xlu0 %v269_v49  ;;  %267 = vadd.xlane.f32.xlu1 %v266_v50 }
 0x1c0   :  { %233 = vadd.xlane.f32.xlu0 %v228_v51  ;;  %273 = vadd.xlane.f32.xlu1 %v272_v53 }
 0x1c4   :  { %231 = vadd.xlane.f32.xlu1 %v227_v54 }
 0x1c9   :  { %v608_v57 = vpop.eup %446 }
 0x1ca   :  { %v280_v58 = vmul.f32 %v608_v57, %v277_v56 }
 0x22b   :  { %v247_v59 = vpop.xlane.xlu0 %246 }
 0x22c   :  { %v295_v0 = vmul.f32 10.0, %v247_v59  ;;  %v283_v22 = vmul.f32 5.0, %v247_v59 }
 0x22e   :  { %v286_v29 = vsub.f32 %v283_v22, %v230_v40 }
 0x22f   :  { %v250_v60 = vpop.xlane.xlu0 %249 }
 0x230   :  { %v296_v11 = vmul.f32 10.0, %v250_v60  ;;  %v289_v32 = vmul.f32 0.25, %v286_v29  ;;  %v284_v34 = vmul.f32 5.0, %v250_v60 }
 0x232   :  { %v313_v38 = vmul.f32 %v445_v55, %v289_v32 }
 0x233   :  { %v253_v61 = vpop.xlane.xlu1 %252 }
 0x234   :  { %v297_v7 = vmul.f32 10.0, %v253_v61  ;;  %v285_v33 = vmul.f32 5.0, %v253_v61 }
 0x245   :  { %v271_v62 = vpop.xlane.xlu0 %270  ;;  %v268_v63 = vpop.xlane.xlu1 %267 }
 0x246   :  { %v292_v2 = vmul.f32 25.0, %v268_v63  ;;  %v293_v4 = vmul.f32 25.0, %v271_v62 }
 0x248   :  { %v298_v3 = vsub.f32 %v292_v2, %v295_v0  ;;  %v299_v14 = vsub.f32 %v293_v4, %v296_v11 }
 0x249   :  { %v234_v5 = vpop.xlane.xlu0 %233  ;;  %v274_v6 = vpop.xlane.xlu1 %273 }
 0x24a   :  { %v301_v8 = vadd.f32 %v298_v3, %v230_v40  ;;  %v237_v9 = vmax.f32 %v234_v5, 1e-16  ;;  %v294_v10 = vmul.f32 25.0, %v274_v6  ;;  %v288_v35 = vsub.f32 %v285_v33, %v234_v5 }
 0x24c   :  { %v304_v12 = vmul.f32 0.0625, %v301_v8  ;;  %v300_v13 = vsub.f32 %v294_v10, %v297_v7  ;;  %448 = vrsqrt.f32 %v237_v9  ;;  %v291_v44 = vmul.f32 0.25, %v288_v35 }
 0x24d   :  { %v232_v15 = vpop.xlane.xlu1 %231 }
 0x24e   :  { %v307_v16 = vmax.f32 %v304_v12, 1e-16  ;;  %v303_v17 = vadd.f32 %v300_v13, %v234_v5  ;;  %v236_v18 = vmax.f32 %v232_v15, 1e-16  ;;  %v302_v21 = vadd.f32 %v299_v14, %v232_v15 }
 0x24f   :  { %v287_v37 = vsub.f32 %v284_v34, %v232_v15 }
 0x250   :  { %450 = vrsqrt.f32 %v307_v16  ;;  %v306_v23 = vmul.f32 0.0625, %v303_v17  ;;  %v305_v24 = vmul.f32 0.0625, %v302_v21 }
 0x251   :  { %452 = vrsqrt.f32 %v236_v18  ;;  %v290_v46 = vmul.f32 0.25, %v287_v37 }
 0x252   :  { %v309_v27 = vmax.f32 %v306_v23, 1e-16  ;;  %v308_v28 = vmax.f32 %v305_v24, 1e-16 }
 0x254   :  { %454 = vrsqrt.f32 %v309_v27 }
 0x255   :  { %456 = vrsqrt.f32 %v308_v28 }
 0x259   :  { %v449_v36 = vpop.eup %448 }
 0x25a   :  { %v279_v43 = vmul.f32 %v449_v36, %v589_v31  ;;  %v315_v47 = vmul.f32 %v449_v36, %v291_v44  ;;  %v329_v31 = vstv %s637_s2  ;;  %v406_v36 = vsel %vm64_vm15, 1.0, %v517_v1  ;;  %s396_s2 = sshll.u32 %s519_s1, 4  ;;  %s397_s2 = int_to_ptr.vmem [resolvable:$true] %s396_s2 }
 0x25b   :  { %s490_s23 = scalar_lea.vmem %s397_s2, 16  ;;  %s494_s24 = scalar_lea.vmem %s397_s2, 32 }
 0x25c   :  { %v282_v54 = vmul.f32 %v608_v57, %v279_v43  ;;  %p491_p5 = scmp.ne.s32.totalorder %s397_s2, %s490_s23  ;;  %p495_p6 = scmp.lt.s32.totalorder %s397_s2, %s397_s2 }
 0x25d   :  { %v451_v39 = vpop.eup %450  ;;  %p496_p7 = scmp.lt.s32.totalorder %s494_s24, %s490_s23 }
 0x25e   :  { %v453_v41 = vpop.eup %452  ;;  %v316_v42 = vmul.f32 %v451_v39, %v313_v38 }
 0x25f   :  { %v278_v40 = vmul.f32 %v453_v41, %v579_v26  ;;  %v314_v51 = vmul.f32 %v453_v41, %v290_v46  ;;  %p497_p8 = por %p496_p7, %p495_p6 }
 0x260   :  { %v319_v48 = vsel %vm564_vm7, %v316_v42, %v280_v58  ;;  %v333_v49 = vadd.f32 1e-06, %v316_v42 }
 0x261   :  { %v455_v50 = vpop.eup %454  ;;  %v322_v52 = vadd.f32 1e-06, %v319_v48  ;;  %v281_v26 = vmul.f32 %v608_v57, %v278_v40  ;;  %p498_p9 = pnand %p497_p8, %p491_p5 }
 0x262   :  { %v457_v53 = vpop.eup %456  ;;  %v318_v55 = vmul.f32 %v455_v50, %v315_v47  ;;  %v336_v56 = vmul.f32 %v333_v49, %v325_v45 }
 0x263   :  { %v317_v59 = vmul.f32 %v457_v53, %v314_v51  ;;  %v326_v60 = vmul.f32 %v325_v45, %v322_v52 }
 0x264   :  { %v321_v19 = vsel %vm585_vm14, %v318_v55, %v282_v54  ;;  %v335_v58 = vadd.f32 1e-06, %v318_v55  ;;  %v339_v61 = vadd.f32 %v336_v56, %v329_v31 }
 0x265   :  { %v320_v62 = vsel %vm573_vm11, %v317_v59, %v281_v26  ;;  %v334_v63 = vadd.f32 1e-06, %v317_v59  ;;  %v330_v0 = vadd.f32 %v329_v31, %v326_v60  ;;  %v324_v2 = vadd.f32 1e-06, %v321_v19 }
 0x266   :  { %v323_v3 = vadd.f32 1e-06, %v320_v62  ;;  %v338_v4 = vmul.f32 %v335_v58, %v325_v45 }
 0x267   :  { %v342_v5 = vmul.f32 1.442695, %v330_v0  ;;  %v328_v6 = vmul.f32 %v325_v45, %v324_v2  ;;  %v337_v7 = vmul.f32 %v334_v63, %v325_v45 }
 0x268   :  { %v327_v8 = vmul.f32 %v325_v45, %v323_v3  ;;  %v341_v57 = vadd.f32 %v338_v4, %v329_v31 }
 0x269   :  { %458 = vpow2.f32 %v342_v5  ;;  %v332_v9 = vadd.f32 %v329_v31, %v328_v6  ;;  %v340_v10 = vadd.f32 %v337_v7, %v329_v31 }
 0x26a   :  { %v331_v30 = vadd.f32 %v329_v31, %v327_v8 }
 0x26b   :  { %v346_v11 = vmul.f32 1.442695, %v332_v9 }
 0x26c   :  { %v344_v12 = vmul.f32 1.442695, %v331_v30 }
 0x26d   :  { %460 = vpow2.f32 %v346_v11 }
 0x26e   :  { %462 = vpow2.f32 %v344_v12 }
 0x276   :  { %v459_v25 = vpop.eup %458 }
 0x277   :  { %v348_v13 = vsel %vm244_vm8, %v459_v25, 0.0 }
 0x278   :  { %349 = vadd.xlane.f32.xlu1 %v348_v13 }
 0x27a   :  { %v461_v14 = vpop.eup %460 }
 0x27b   :  { %v463_v15 = vpop.eup %462  ;;  %v354_v16 = vsel %vm244_vm8, %v461_v14, 0.0 }
 0x27c   :  { %355 = vadd.xlane.f32.xlu1 %v354_v16  ;;  %v351_v17 = vsel %vm244_vm8, %v463_v15, 0.0 }
 0x27d   :  { %352 = vadd.xlane.f32.xlu0 %v351_v17 }
 0x301   :  { %v350_v18 = vpop.xlane.xlu1 %349 }
 0x302   :  { %v357_v21 = vadd.f32 1e-06, %v350_v18 }
 0x304   :  { %464 = vlog2.f32 %v357_v21 }
 0x305   :  { %v356_v22 = vpop.xlane.xlu1 %355 }
 0x306   :  { %v353_v23 = vpop.xlane.xlu0 %352  ;;  %v359_v24 = vadd.f32 1e-06, %v356_v22 }
 0x307   :  { %v358_v27 = vadd.f32 1e-06, %v353_v23 }
 0x308   :  { %466 = vlog2.f32 %v359_v24 }
 0x309   :  { %468 = vlog2.f32 %v358_v27 }
 0x311   :  { %v465_v28 = vpop.eup %464 }
 0x312   :  { %v361_v29 = vmul.f32 0.6931472, %v465_v28 }
 0x314   :  { %v366_v37 = vsub.f32 %v361_v29, %v339_v61 }
 0x315   :  { %v467_v32 = vpop.eup %466 }
 0x316   :  { %v469_v33 = vpop.eup %468  ;;  %v365_v34 = vmul.f32 0.6931472, %v467_v32  ;;  %v373_v42 = vsel %vm372_vm0, %v366_v37, 0.0 }
 0x317   :  { %v363_v35 = vmul.f32 0.6931472, %v469_v33 }
 0x318   :  { %v368_v38 = vsub.f32 %v365_v34, %v341_v57 }
 0x319   :  { %v367_v39 = vsub.f32 %v363_v35, %v340_v10 }
 0x31a   :  { %v371_v41 = vmul.f32 %v406_v36, %v368_v38 }
 0x31b   :  { %v374_v43 = vsel %vm372_vm0, %v367_v39, 0.0 }
 0x31c   :  { %v375_v44 = vadd.f32 %v374_v43, %v373_v42  ;;  %v376_v45 = vsel %vm372_vm0, %v371_v41, 0.0 }
 0x31e   :  { %v377_v40 = vadd.f32 %v376_v45, %v375_v44 }
 0x320   :  { %378 = vadd.xlane.f32.xlu0 %v377_v40 }
 0x3a9   :  { %v379_v46 = vpop.xlane.xlu0 %378 }
 0x3aa   :  { %v380_v47 = vrot.slane %v379_v46, 4 }
 0x3ac   :  { %v381_v20 = vadd.f32 %v380_v47, %v379_v46 }
 0x3ae   :  { %v382_v48 = vrot.slane %v381_v20, 2 }
 0x3b0   :  { %v383_v49 = vadd.f32 %v382_v48, %v381_v20 }
 0x3b2   :  { %v384_v50 = vrot.slane %v383_v49, 1 }
 0x3b4   :  { %v385_v51 = vadd.f32 %v384_v50, %v383_v49 }
 0x3b6   :  { %436 = vpush %v385_v51 }
 0x3e7   :  { %s437_s22 = spop %436 }
 0x3e8   :  { %v387_v1 = vstv %s437_s22 }
 0x3e9   :  { %389 = vst.msk [vmem:[#allocation7] sm:$0x1] %vm388_vm1, %v387_v1 }
 0x3ea   :  { %501 = shalt.err (!%p498_p9)
}
 0x3eb   :  { %399 = dma.vmem_to_hbm [thread:$0]  %s397_s2, 16, %s638_s3, [#allocation6]  }
 0x3ec   :  { %512 = dma.done.wait [#allocation6], 16  }
 0x3ed   :  { %513 = vsyncadd [#allocation6], 4294967280 }
 0x3ee   :  { %403 = vsyncpa [#allocation5], 1 }
 0x3ef   :  { %404 = vsyncpa [#allocation6], 1 }

</bundles_post_ra>
